<compile_context>
chip_gen: v6e
topology: v6e:2x2x1
jax: 0.10.0
libtpu: 0.0.40
codegen_flags: <defaults>
</compile_context>

<pallas_src>
import functools

import jax
import jax.numpy as jnp
from jax.experimental import pallas as pl
from jax.experimental.pallas import tpu as pltpu

BN_EPS = 1e-5
LANES = 128
SUBLANES = 8


def _round_up(n, m):
    return ((n + m - 1) // m) * m


def _mlp_kernel(x_ref, w1_ref, w2_ref, w3_ref, bias_ref, out_ref):
    """Fused fc1(+BN1 folded) -> relu -> fc2(+BN2 folded) -> relu -> fc3.

    All weight column counts are multiples of 128, so every slice of the
    packed bias operand and every store below is lane-dense.
    """
    x = x_ref[...]
    biases = bias_ref[...]                      # (3, bias_lanes) f32, one DMA
    f1 = w1_ref.shape[1]
    f2 = w2_ref.shape[1]
    f3 = w3_ref.shape[1]
    b1 = biases[0:1, 0:f1]
    b2 = biases[1:2, 0:f2]
    b3 = biases[2:3, 0:f3]

    # fc1 (+ folded BN1) -> relu      (dropout1 = identity in eval)
    h1 = jnp.dot(x, w1_ref[...], preferred_element_type=jnp.float32) + b1
    h1 = jnp.maximum(h1, 0.0).astype(w2_ref.dtype)

    # fc2 (+ folded BN2) -> relu      (dropout2 = identity in eval)
    h2 = jnp.dot(h1, w2_ref[...], preferred_element_type=jnp.float32) + b2
    h2 = jnp.maximum(h2, 0.0).astype(w3_ref.dtype)

    # fc3 (lane-padded columns; pad cols are exactly zero)
    out = jnp.dot(h2, w3_ref[...], preferred_element_type=jnp.float32) + b3
    out_ref[...] = out.astype(out_ref.dtype)


def prepare_params(params, use_bf16=False):
    """One-time prep: fold eval-mode BN into the Linears, pad to lane-dense
    widths, pack the three bias rows into a single operand, optional bf16.

    Returns (prepared_operands_dict, out_features).
    """
    first = params["w1"].shape[1]
    second = params["w2"].shape[1]
    out_f = params["w3"].shape[1]
    first_p = _round_up(first, LANES)
    second_p = _round_up(second, LANES)
    out_p = _round_up(out_f, LANES)
    bias_lanes = max(first_p, second_p, out_p)

    # ---- Fold eval-mode BatchNorm into the adjacent Linear layers ----
    scale1 = params["g1"] * jax.lax.rsqrt(params["var1"] + BN_EPS)   # (1, first)
    w1 = params["w1"] * scale1
    b1 = (params["b1"] - params["mean1"]) * scale1 + params["beta1"]
    scale2 = params["g2"] * jax.lax.rsqrt(params["var2"] + BN_EPS)   # (1, second)
    w2 = params["w2"] * scale2
    b2 = (params["b2"] - params["mean2"]) * scale2 + params["beta2"]
    w3, b3 = params["w3"], params["b3"]

    # ---- Zero-pad every feature dim to a multiple of 128 lanes ----
    # Padded columns produce ReLU(0*x + 0) = 0; padded rows contribute 0 to
    # the next contraction, so the math is exact.
    w1 = jnp.pad(w1, ((0, 0), (0, first_p - first)))
    w2 = jnp.pad(w2, ((0, first_p - first), (0, second_p - second)))
    w3 = jnp.pad(w3, ((0, second_p - second), (0, out_p - out_f)))

    # ---- Pack the three bias rows into a single small operand ----
    biases = jnp.zeros((3, bias_lanes), jnp.float32)
    biases = biases.at[0, :first].set(b1[0])
    biases = biases.at[1, :second].set(b2[0])
    biases = biases.at[2, :out_f].set(b3[0])

    # Persistent weight dtype (bf16 worthwhile on v6e/v7x at realistic widths).
    wdtype = jnp.bfloat16 if use_bf16 else jnp.float32
    prepared = dict(
        w1=w1.astype(wdtype),
        w2=w2.astype(wdtype),
        w3=w3.astype(wdtype),
        biases=biases,
    )
    return prepared, out_f


@functools.partial(
    jax.jit, static_argnames=("tile_b", "min_steps", "vmem_budget_bytes"))
def mlp_forward(x, prepared, tile_b=2048, min_steps=1,
                vmem_budget_bytes=40 * 1024 * 1024):
    """Fused MLP forward with one pallas_call.

    x: (B, in_features) float32.
    prepared: output of prepare_params (folded / padded / packed operands).
    tile_b: max batch-tile rows (fatter tiles amortize the ~0.35 us/step cost).
    min_steps: set to 2 on v7x for large B so the "parallel" batch axis is
               actually split across its two TensorCores.
    vmem_budget_bytes: budget used to cap the batch tile (sized so single-
               buffered weights + double-buffered x/out tiles fit comfortably
               on v7x's 64 MiB VMEM as well as v6e/v5e).

    Returns the lane-padded (B, out_pad) result; slice [:, :out_features] at
    the consumer (kept padded here so the kernel's stores stay unmasked and
    no eager wrapper-side slice copy is issued).
    """
    w1 = prepared["w1"]
    w2 = prepared["w2"]
    w3 = prepared["w3"]
    biases = prepared["biases"]
    B, in_f = x.shape
    out_pad = w3.shape[1]

    if w1.dtype == jnp.bfloat16:
        x = x.astype(jnp.bfloat16)

    # ---- Batch-tile selection from a VMEM budget ----
    x_bytes = jnp.dtype(x.dtype).itemsize
    w_bytes = sum(int(a.size) * jnp.dtype(a.dtype).itemsize
                  for a in (w1, w2, w3, biases))          # single-buffered
    row_bytes = in_f * x_bytes + out_pad * 4              # x row + f32 out row
    tile_budget = max(vmem_budget_bytes - w_bytes, 4 * SUBLANES * row_bytes)
    tb_vmem = max((tile_budget // (2 * row_bytes)) // SUBLANES * SUBLANES,
                  SUBLANES)                               # double-buffered tiles

    tb = min(tile_b, tb_vmem)
    if min_steps > 1:
        # v7x megacore: make sure there are at least min_steps grid steps.
        tb = min(tb, max(_round_up(pl.cdiv(B, min_steps), SUBLANES), SUBLANES))
    if B <= tb:
        tb = B            # block == full array dim (8-divisibility exception)
    else:
        tb = max((tb // SUBLANES) * SUBLANES, SUBLANES)
    grid = (pl.cdiv(B, tb),)

    # ---- Advisory cost + explicit scoped-VMEM limit ----
    flops = 2 * B * (in_f * w1.shape[1]
                     + w2.shape[0] * w2.shape[1]
                     + w3.shape[0] * out_pad)
    bytes_accessed = int(B * in_f * x_bytes + w_bytes + B * out_pad * 4)
    cost = pl.CostEstimate(flops=flops, transcendentals=0,
                           bytes_accessed=bytes_accessed)
    vmem_needed = w_bytes + 2 * tb * row_bytes
    vmem_limit = int(min(64 * 1024 * 1024,
                         max(int(vmem_needed * 1.5) + (2 << 20), 8 << 20)))

    resident = pl.Buffered(1)   # constant index_map -> single-buffer weights

    y = pl.pallas_call(
        _mlp_kernel,
        out_shape=jax.ShapeDtypeStruct((B, out_pad), jnp.float32),
        grid=grid,
        in_specs=[
            pl.BlockSpec((tb, in_f), lambda i: (i, 0)),     # x: tiled over batch
            pl.BlockSpec(w1.shape, lambda i: (0, 0), pipeline_mode=resident),
            pl.BlockSpec(w2.shape, lambda i: (0, 0), pipeline_mode=resident),
            pl.BlockSpec(w3.shape, lambda i: (0, 0), pipeline_mode=resident),
            pl.BlockSpec(biases.shape, lambda i: (0, 0), pipeline_mode=resident),
        ],
        out_specs=pl.BlockSpec((tb, out_pad), lambda i: (i, 0)),
        compiler_params=pltpu.CompilerParams(
            dimension_semantics=("parallel",),   # megacore sharding on v7x
            vmem_limit_bytes=vmem_limit,
        ),
        cost_estimate=cost,
    )(x, w1, w2, w3, biases)

    return y   # lane-padded; consumer slices [:, :out_features] lazily


def init_params(key, in_features, first, second, out_features):
    """Deterministic synthetic parameter init (shapes match nn.Module.__init__)."""
    ks = jax.random.split(key, 8)

    def linear(kw, kb, fan_in, fan_out):
        bound = 1.0 / jnp.sqrt(fan_in)
        # stored already transposed: (in, out)
        w = jax.random.uniform(kw, (fan_in, fan_out), jnp.float32, -bound, bound)
        b = jax.random.uniform(kb, (1, fan_out), jnp.float32, -bound, bound)
        return w, b

    w1, b1 = linear(ks[0], ks[1], in_features, first)
    w2, b2 = linear(ks[2], ks[3], first, second)
    w3, b3 = linear(ks[4], ks[5], second, out_features)

    # BN params: nontrivial deterministic values to exercise the math.
    g1 = 1.0 + 0.1 * jax.random.normal(ks[6], (1, first), jnp.float32)
    beta1 = 0.05 * jnp.ones((1, first), jnp.float32)
    mean1 = 0.1 * jax.random.normal(ks[7], (1, first), jnp.float32)
    var1 = jnp.linspace(0.5, 1.5, first, dtype=jnp.float32).reshape(1, first)

    g2 = jnp.linspace(0.9, 1.1, second, dtype=jnp.float32).reshape(1, second)
    beta2 = -0.05 * jnp.ones((1, second), jnp.float32)
    mean2 = jnp.linspace(-0.1, 0.1, second, dtype=jnp.float32).reshape(1, second)
    var2 = jnp.linspace(0.8, 1.2, second, dtype=jnp.float32).reshape(1, second)

    return dict(
        w1=w1, b1=b1, g1=g1, beta1=beta1, mean1=mean1, var1=var1,
        w2=w2, b2=b2, g2=g2, beta2=beta2, mean2=mean2, var2=var2,
        w3=w3, b3=b3,
    )


def _reference(x, p):
    """Pure-JAX reference (same eval semantics) for a sanity check."""
    h1 = x @ p["w1"] + p["b1"]
    h1 = (h1 - p["mean1"]) * (p["g1"] / jnp.sqrt(p["var1"] + BN_EPS)) + p["beta1"]
    h1 = jnp.maximum(h1, 0.0)
    h2 = h1 @ p["w2"] + p["b2"]
    h2 = (h2 - p["mean2"]) * (p["g2"] / jnp.sqrt(p["var2"] + BN_EPS)) + p["beta2"]
    h2 = jnp.maximum(h2, 0.0)
    return h2 @ p["w3"] + p["b3"]


if __name__ == "__main__":
    # model_params = {'in_features': 32, 'first_layer_size': 64,
    #                 'second_layes_size': 32, 'out_features': 16}
    B, IN_F, FIRST, SECOND, OUT_F = 8, 32, 64, 32, 16

    key = jax.random.PRNGKey(0)
    kx, kp = jax.random.split(key)
    x = jax.random.normal(kx, (B, IN_F), jnp.float32)
    params = init_params(kp, IN_F, FIRST, SECOND, OUT_F)

    # One-time prep: BN folding, lane padding, bias packing (f32 at toy sizes;
    # pass use_bf16=True on v6e/v7x once feature widths are realistic).
    prepared, out_f = prepare_params(params, use_bf16=False)

    y_padded = mlp_forward(x, prepared)
    y_padded = jax.block_until_ready(y_padded)
    out = y_padded[:, :out_f]            # consumer-side (lazy) slice

    ref = _reference(x, params)
    assert out.shape == (B, OUT_F)
    assert jnp.allclose(out, ref, atol=1e-4, rtol=1e-4), "mismatch vs reference"

    print("KERNEL_OK")
</pallas_src>

<mosaic_0001>
module attributes {stable_mosaic.version = 11 : i64} {
  func.func @_mlp_kernel(%arg0: i32, %arg1: memref<8x32xf32, #tpu.memory_space<vmem>>, %arg2: memref<32x128xf32, #tpu.memory_space<vmem>>, %arg3: memref<128x128xf32, #tpu.memory_space<vmem>>, %arg4: memref<128x128xf32, #tpu.memory_space<vmem>>, %arg5: memref<3x128xf32, #tpu.memory_space<vmem>>, %arg6: memref<8x128xf32, #tpu.memory_space<vmem>>) attributes {dimension_semantics = [#tpu.dimension_semantics<parallel>], iteration_bounds = array<i64: 1>, scalar_prefetch = 0 : i64, scratch_operands = 0 : i64, tpu.core_type = #tpu.core_type<tc>, window_params = [{transform_indices = @transform_0, window_bounds = array<i64: 8, 32>}, {pipeline_mode = #tpu.pipeline_mode<synchronous>, transform_indices = @transform_1, window_bounds = array<i64: 32, 128>}, {pipeline_mode = #tpu.pipeline_mode<synchronous>, transform_indices = @transform_2, window_bounds = array<i64: 128, 128>}, {pipeline_mode = #tpu.pipeline_mode<synchronous>, transform_indices = @transform_3, window_bounds = array<i64: 128, 128>}, {pipeline_mode = #tpu.pipeline_mode<synchronous>, transform_indices = @transform_4, window_bounds = array<i64: 3, 128>}, {transform_indices = @transform_5, window_bounds = array<i64: 8, 128>}]} {
    %c0 = arith.constant 0 : index
    %c0_0 = arith.constant 0 : index
    %0 = vector.load %arg1[%c0, %c0_0] : memref<8x32xf32, #tpu.memory_space<vmem>>, vector<8x32xf32>
    %c0_1 = arith.constant 0 : index
    %c0_2 = arith.constant 0 : index
    %1 = vector.load %arg5[%c0_1, %c0_2] : memref<3x128xf32, #tpu.memory_space<vmem>>, vector<3x128xf32>
    %2 = vector.extract_strided_slice %1 {offsets = [0, 0], sizes = [1, 128], strides = [1, 1]} : vector<3x128xf32> to vector<1x128xf32>
    %3 = vector.extract_strided_slice %1 {offsets = [1, 0], sizes = [1, 128], strides = [1, 1]} : vector<3x128xf32> to vector<1x128xf32>
    %4 = vector.extract_strided_slice %1 {offsets = [2, 0], sizes = [1, 128], strides = [1, 1]} : vector<3x128xf32> to vector<1x128xf32>
    %c0_3 = arith.constant 0 : index
    %c0_4 = arith.constant 0 : index
    %5 = vector.load %arg2[%c0_3, %c0_4] : memref<32x128xf32, #tpu.memory_space<vmem>>, vector<32x128xf32>
    %cst = arith.constant dense<0.000000e+00> : vector<8x128xf32>
    %6 = tpu.matmul %0, %5, %cst {dimension_numbers = #tpu.dot_dimension_numbers<[1], [0], [0], [1], [0, 0, 1, 1], [], []>} : vector<8x32xf32>, vector<32x128xf32>, vector<8x128xf32> -> vector<8x128xf32>
    %7 = vector.broadcast %2 : vector<1x128xf32> to vector<8x128xf32>
    %8 = arith.addf %6, %7 : vector<8x128xf32>
    %cst_5 = arith.constant 0.000000e+00 : f32
    %9 = vector.broadcast %cst_5 : f32 to vector<8x128xf32>
    %10 = arith.maximumf %8, %9 : vector<8x128xf32>
    %c0_6 = arith.constant 0 : index
    %c0_7 = arith.constant 0 : index
    %11 = vector.load %arg3[%c0_6, %c0_7] : memref<128x128xf32, #tpu.memory_space<vmem>>, vector<128x128xf32>
    %cst_8 = arith.constant dense<0.000000e+00> : vector<8x128xf32>
    %12 = tpu.matmul %10, %11, %cst_8 {dimension_numbers = #tpu.dot_dimension_numbers<[1], [0], [0], [1], [0, 0, 1, 1], [], []>} : vector<8x128xf32>, vector<128x128xf32>, vector<8x128xf32> -> vector<8x128xf32>
    %13 = vector.broadcast %3 : vector<1x128xf32> to vector<8x128xf32>
    %14 = arith.addf %12, %13 : vector<8x128xf32>
    %cst_9 = arith.constant 0.000000e+00 : f32
    %15 = vector.broadcast %cst_9 : f32 to vector<8x128xf32>
    %16 = arith.maximumf %14, %15 : vector<8x128xf32>
    %c0_10 = arith.constant 0 : index
    %c0_11 = arith.constant 0 : index
    %17 = vector.load %arg4[%c0_10, %c0_11] : memref<128x128xf32, #tpu.memory_space<vmem>>, vector<128x128xf32>
    %cst_12 = arith.constant dense<0.000000e+00> : vector<8x128xf32>
    %18 = tpu.matmul %16, %17, %cst_12 {dimension_numbers = #tpu.dot_dimension_numbers<[1], [0], [0], [1], [0, 0, 1, 1], [], []>} : vector<8x128xf32>, vector<128x128xf32>, vector<8x128xf32> -> vector<8x128xf32>
    %19 = vector.broadcast %4 : vector<1x128xf32> to vector<8x128xf32>
    %20 = arith.addf %18, %19 : vector<8x128xf32>
    %c0_13 = arith.constant 0 : index
    %c0_14 = arith.constant 0 : index
    %21 = vector.load %arg6[%c0_13, %c0_14] : memref<8x128xf32, #tpu.memory_space<vmem>>, vector<8x128xf32>
    tpu.vector_store %arg6[%c0_13, %c0_14], %20 {strides = array<i32>} : memref<8x128xf32, #tpu.memory_space<vmem>>, vector<8x128xf32>,
    return
  }
  func.func @transform_0(%arg0: i32) -> (i32, i32) {
    %c0_i32 = arith.constant 0 : i32
    %c0_i32_0 = arith.constant 0 : i32
    return %arg0, %c0_i32 : i32, i32
  }
  func.func @transform_1(%arg0: i32) -> (i32, i32) {
    %c0_i32 = arith.constant 0 : i32
    %c0_i32_0 = arith.constant 0 : i32
    %c0_i32_1 = arith.constant 0 : i32
    return %c0_i32, %c0_i32_0 : i32, i32
  }
  func.func @transform_2(%arg0: i32) -> (i32, i32) {
    %c0_i32 = arith.constant 0 : i32
    %c0_i32_0 = arith.constant 0 : i32
    %c0_i32_1 = arith.constant 0 : i32
    return %c0_i32, %c0_i32_0 : i32, i32
  }
  func.func @transform_3(%arg0: i32) -> (i32, i32) {
    %c0_i32 = arith.constant 0 : i32
    %c0_i32_0 = arith.constant 0 : i32
    %c0_i32_1 = arith.constant 0 : i32
    return %c0_i32, %c0_i32_0 : i32, i32
  }
  func.func @transform_4(%arg0: i32) -> (i32, i32) {
    %c0_i32 = arith.constant 0 : i32
    %c0_i32_0 = arith.constant 0 : i32
    %c0_i32_1 = arith.constant 0 : i32
    return %c0_i32, %c0_i32_0 : i32, i32
  }
  func.func @transform_5(%arg0: i32) -> (i32, i32) {
    %c0_i32 = arith.constant 0 : i32
    %c0_i32_0 = arith.constant 0 : i32
    return %arg0, %c0_i32 : i32, i32
  }
}

</mosaic_0001>

<bundles_post_ra>
// kernel: mlp_forward.1
= control target key start
LH: loop header
LB: loop body
LE: loop exit
PB: predicated region body
PF: predicated region fallthrough
CT: control target
= control target key end

     0   :  { %10 = vsyncpa [#allocation3], 0  ;;  %s737_s0 = inlined_call_operand.hbm [shape: f32[8,32], index: 0, kind: input, shape index: {}]   ;;  %s738_s1 = inlined_call_operand.hbm [shape: f32[32,128], index: 1, kind: input, shape index: {}]   ;;  %s739_s2 = inlined_call_operand.hbm [shape: f32[128,128], index: 2, kind: input, shape index: {}]   ;;  %s740_s3 = inlined_call_operand.hbm [shape: f32[128,128], index: 3, kind: input, shape index: {}]   ;;  %s741_s4 = inlined_call_operand.hbm [shape: f32[3,128], index: 4, kind: input, shape index: {}]   ;;  %s742_s5 = inlined_call_operand.hbm [shape: f32[8,128], index: 5, kind: output, shape index: {}]  }
   0x1   :  { %11 = vsyncpa [#allocation6], 0 }
   0x2   :  { %12 = vsyncpa [#allocation9], 0 }
   0x3   :  { %13 = vsyncpa [#allocation4], 0  ;;  %s628_s18 = smov [#allocation5]  }
   0x4   :  { %s29_s19 = sshll.u32 %s628_s18, 4  ;;  %s30_s19 = int_to_ptr.vmem [resolvable:$true] %s29_s19 }
   0x5   :  { %s508_s20 = scalar_lea.vmem %s30_s19, 512  ;;  %p513_p1 = scmp.lt.s32.totalorder %s30_s19, %s30_s19 }
   0x6   :  { %p509_p0 = scmp.ne.s32.totalorder %s30_s19, %s508_s20  ;;  %p514_p2 = scmp.lt.s32.totalorder %s508_s20, %s508_s20 }
   0x8   :  { %p515_p3 = por %p514_p2, %p513_p1 }
   0xa   :  { %p516_p4 = pnand %p515_p3, %p509_p0 }
   0xc   :  { %519 = shalt.err (!%p516_p4)
}
   0xd   :  { %s629_s21 = smov 128   ;;  %s630_s22 = smov 8  }
   0xe   :  { %35 = dma.hbm_to_vmem [thread:$0]  %s738_s1, 512, %s30_s19, [#allocation6], %s629_s21, %s629_s21, %s630_s22  }
   0xf   :  { %s631_s25 = smov [#allocation8]   ;;  %s632_s27 = smov [#allocation2]  }
  0x10   :  { %s53_s26 = sshll.u32 %s631_s25, 4  ;;  %s20_s28 = sshll.u32 %s632_s27, 4  ;;  %s54_s26 = int_to_ptr.vmem [resolvable:$true] %s53_s26  ;;  %s21_s28 = int_to_ptr.vmem [resolvable:$true] %s20_s28 }
  0x11   :  { %s528_s29 = scalar_lea.vmem %s54_s26, 2048  ;;  %p533_p6 = scmp.lt.s32.totalorder %s54_s26, %s54_s26 }
  0x12   :  { %p529_p5 = scmp.ne.s32.totalorder %s54_s26, %s528_s29  ;;  %p534_p7 = scmp.lt.s32.totalorder %s528_s29, %s528_s29 }
  0x14   :  { %p535_p8 = por %p534_p7, %p533_p6 }
  0x16   :  { %p536_p9 = pnand %p535_p8, %p529_p5 }
  0x18   :  { %539 = shalt.err (!%p536_p9)
}
  0x19   :  { %59 = dma.hbm_to_vmem [thread:$0]  %s740_s3, 2048, %s54_s26, [#allocation9], %s629_s21, %s629_s21, %s630_s22  }
  0x1a   :  { %s548_s1 = scalar_lea.vmem %s21_s28, 128  ;;  %p553_p11 = scmp.lt.s32.totalorder %s21_s28, %s21_s28 }
  0x1b   :  { %p549_p10 = scmp.ne.s32.totalorder %s21_s28, %s548_s1  ;;  %p554_p12 = scmp.lt.s32.totalorder %s548_s1, %s548_s1 }
  0x1d   :  { %p555_p13 = por %p554_p12, %p553_p11 }
  0x1f   :  { %p556_p0 = pnand %p555_p13, %p549_p10 }
  0x21   :  { %559 = shalt.err (!%p556_p0)
}
  0x22   :  { %23 = dma.hbm_to_vmem [thread:$0]  %s737_s0, 128, %s21_s28, [#allocation3]  }
  0x23   :  { %s633_s9 = smov [#allocation7]   ;;  %s634_s11 = smov [#allocation10]  }
  0x24   :  { %s41_s10 = sshll.u32 %s633_s9, 4  ;;  %s66_s12 = sshll.u32 %s634_s11, 4  ;;  %s42_s10 = int_to_ptr.vmem [resolvable:$true] %s41_s10  ;;  %s67_s12 = int_to_ptr.vmem [resolvable:$true] %s66_s12 }
  0x25   :  { %s568_s13 = scalar_lea.vmem %s42_s10, 2048  ;;  %p573_p2 = scmp.lt.s32.totalorder %s42_s10, %s42_s10 }
  0x26   :  { %p569_p1 = scmp.ne.s32.totalorder %s42_s10, %s568_s13  ;;  %p574_p3 = scmp.lt.s32.totalorder %s568_s13, %s568_s13 }
  0x28   :  { %p575_p4 = por %p574_p3, %p573_p2 }
  0x2a   :  { %p576_p5 = pnand %p575_p4, %p569_p1 }
  0x2c   :  { %579 = shalt.err (!%p576_p5)
}
  0x2d   :  { %47 = dma.hbm_to_vmem [thread:$0]  %s739_s2, 2048, %s42_s10, [#allocation6], %s629_s21, %s629_s21, %s630_s22  }
  0x2e   :  { %s588_s0 = scalar_lea.vmem %s67_s12, 64  ;;  %p593_p7 = scmp.lt.s32.totalorder %s67_s12, %s67_s12 }
  0x2f   :  { %p589_p6 = scmp.ne.s32.totalorder %s67_s12, %s588_s0  ;;  %p594_p8 = scmp.lt.s32.totalorder %s588_s0, %s588_s0 }
  0x31   :  { %p595_p9 = por %p594_p8, %p593_p7 }
  0x33   :  { %p596_p10 = pnand %p595_p9, %p589_p6 }
  0x35   :  { %599 = shalt.err (!%p596_p10)
}
  0x36   :  { %69 = dma.hbm_to_vmem [thread:$0]  %s741_s4, 64, %s67_s12, [#allocation9]  }
  0x37   :  { %620 = dma.done.wait [#allocation3], 128  }
  0x38   :  { %621 = vsyncadd [#allocation3], 4294967168 }
  0x39   :  { %622 = dma.done.wait [#allocation6], 2560  }
  0x3a   :  { %623 = vsyncadd [#allocation6], 4294964736 }
  0x3b   :  { %624 = dma.done.wait [#allocation9], 2112  }
  0x3c   :  { %625 = vsyncadd [#allocation9], 4294965184  ;;  %v635_v0 = vmov 0.0   ;;  %vm636_vm0 = vmmov 0   ;;  %v90_v1 = vld [vmem:[#allocation5 + $0x18] sm:$0xff]  ;;  %v89_v2 = vld [vmem:[#allocation5 + $0x10] sm:$0xff]  ;;  %v91_v35 = vlaneseq }
  0x3d   :  { %409 = vmatprep.subr.mxu0 %v635_v0  ;;  %417 = vmatprep.mubr.msk.f32.mxu0 %vm636_vm0, %v635_v0  ;;  %v185_v3 = vld [vmem:[#allocation7 + $0x78] sm:$0xff]  ;;  %v88_v4 = vld [vmem:[#allocation5 + $0x8] sm:$0xff]  ;;  %v184_v5 = vld [vmem:[#allocation7 + $0x70] sm:$0xff]  ;;  %vm95_vm1 = vcmask 261120   ;;  %s637_s2 = smov [#allocation11]  }
  0x3e   :  { %420 = vmatprep.subr.mxu1 %v635_v0  ;;  %452 = vmatprep.mubr.msk.f32.mxu1 %vm636_vm0, %v635_v0  ;;  %v183_v6 = vld [vmem:[#allocation7 + $0x68] sm:$0xff]  ;;  %v87_v7 = vld [vmem:[#allocation5] sm:$0xff]  ;;  %v85_v8 = vld [vmem:[#allocation2] sm:$0xff]  ;;  %v92_v36 = vshrl.u32 %v91_v35, 7  ;;  %s358_s4 = sshll.u32 %s637_s2, 4  ;;  %s359_s4 = int_to_ptr.vmem [resolvable:$true] %s358_s4 }
  0x3f   :  { %410 = vmatpush3.msra.mxu0 %v90_v1  ;;  %421 = vmatpush3.msra.mxu1 %v185_v3  ;;  %v182_v9 = vld [vmem:[#allocation7 + $0x60] sm:$0xff]  ;;  %v181_v10 = vld [vmem:[#allocation7 + $0x58] sm:$0xff]  ;;  %v180_v11 = vld [vmem:[#allocation7 + $0x50] sm:$0xff]  ;;  %s600_s17 = scalar_lea.vmem %s359_s4, 128  ;;  %p605_p12 = scmp.lt.s32.totalorder %s359_s4, %s359_s4 }
  0x40   :  { %411 = vmatprep.subr.mxu0 %v635_v0  ;;  %422 = vmatprep.subr.mxu1 %v635_v0  ;;  %v179_v12 = vld [vmem:[#allocation7 + $0x48] sm:$0xff]  ;;  %v178_v13 = vld [vmem:[#allocation7 + $0x40] sm:$0xff]  ;;  %v177_v14 = vld [vmem:[#allocation7 + $0x38] sm:$0xff]  ;;  %v93_v37 = vsub.s32 0, %v92_v36  ;;  %v188_v47 = vsub.s32 1, %v92_v36  ;;  %v279_v53 = vsub.s32 2, %v92_v36  ;;  %p601_p11 = scmp.ne.s32.totalorder %s359_s4, %s600_s17  ;;  %p606_p13 = scmp.lt.s32.totalorder %s600_s17, %s600_s17 }
  0x41   :  { %412 = vmatpush3.msra.mxu0 %v89_v2  ;;  %423 = vmatpush3.msra.mxu1 %v184_v5  ;;  %v176_v15 = vld [vmem:[#allocation7 + $0x30] sm:$0xff]  ;;  %v175_v16 = vld [vmem:[#allocation7 + $0x28] sm:$0xff]  ;;  %v174_v17 = vld [vmem:[#allocation7 + $0x20] sm:$0xff] }
  0x42   :  { %413 = vmatprep.subr.mxu0 %v635_v0  ;;  %424 = vmatprep.subr.mxu1 %v635_v0  ;;  %v173_v18 = vld [vmem:[#allocation7 + $0x18] sm:$0xff]  ;;  %v172_v19 = vld [vmem:[#allocation7 + $0x10] sm:$0xff]  ;;  %v171_v20 = vld [vmem:[#allocation7 + $0x8] sm:$0xff]  ;;  %p607_p0 = por %p606_p13, %p605_p12 }
  0x43   :  { %414 = vmatpush3.msra.mxu0 %v88_v4  ;;  %425 = vmatpush3.msra.mxu1 %v183_v6  ;;  %v170_v21 = vld [vmem:[#allocation7] sm:$0xff]  ;;  %v276_v22 = vld [vmem:[#allocation8 + $0x78] sm:$0xff]  ;;  %v275_v23 = vld [vmem:[#allocation8 + $0x70] sm:$0xff] }
  0x44   :  { %415 = vmatprep.subr.mxu0 %v635_v0  ;;  %426 = vmatprep.subr.mxu1 %v635_v0  ;;  %v274_v24 = vld [vmem:[#allocation8 + $0x68] sm:$0xff]  ;;  %v273_v25 = vld [vmem:[#allocation8 + $0x60] sm:$0xff]  ;;  %v272_v26 = vld [vmem:[#allocation8 + $0x58] sm:$0xff]  ;;  %p608_p1 = pnand %p607_p0, %p601_p11 }
  0x45   :  { %416 = vmatpush3.msra.mxu0 %v87_v7  ;;  %427 = vmatpush3.msra.mxu1 %v182_v9  ;;  %v271_v27 = vld [vmem:[#allocation8 + $0x50] sm:$0xff]  ;;  %v270_v28 = vld [vmem:[#allocation8 + $0x48] sm:$0xff]  ;;  %v269_v29 = vld [vmem:[#allocation8 + $0x40] sm:$0xff] }
  0x46   :  { %418 = vmatmul.mubr.msk.f32.vlgmr.msra.gmra.mxu0 %vm95_vm1, %v85_v8  ;;  %428 = vmatprep.subr.mxu1 %v635_v0  ;;  %v268_v30 = vld [vmem:[#allocation8 + $0x38] sm:$0xff]  ;;  %v267_v31 = vld [vmem:[#allocation8 + $0x30] sm:$0xff]  ;;  %v266_v32 = vld [vmem:[#allocation8 + $0x28] sm:$0xff] }
  0x47   :  { %455 = vmatprep.subr.mxu0 %v635_v0  ;;  %429 = vmatpush3.msra.mxu1 %v181_v10  ;;  %v265_v33 = vld [vmem:[#allocation8 + $0x20] sm:$0xff]  ;;  %v264_v34 = vld [vmem:[#allocation8 + $0x18] sm:$0xff]  ;;  %v263_v44 = vld [vmem:[#allocation8 + $0x10] sm:$0xff] }
  0x48   :  { %487 = vmatprep.mubr.msk.f32.mxu0 %vm636_vm0, %v635_v0  ;;  %430 = vmatprep.subr.mxu1 %v635_v0  ;;  %v86_v38 = vld [vmem:[#allocation10] sm:$0x7]  ;;  %v262_v45 = vld [vmem:[#allocation8 + $0x8] sm:$0xff] }
  0x49   :  { %431 = vmatpush3.msra.mxu1 %v180_v11  ;;  %456 = vmatpush3.msra.mxu0 %v276_v22  ;;  %v94_v39 = vrot.slane %v86_v38, %v93_v37  ;;  %v261_v46 = vld [vmem:[#allocation8] sm:$0xff]  ;;  %v189_v48 = vrot.slane %v86_v38, %v188_v47  ;;  %v280_v54 = vrot.slane %v86_v38, %v279_v53 }
  0x4a   :  { %432 = vmatprep.subr.mxu1 %v635_v0  ;;  %457 = vmatprep.subr.mxu0 %v635_v0 }
  0x4b   :  { %433 = vmatpush3.msra.mxu1 %v179_v12  ;;  %458 = vmatpush3.msra.mxu0 %v275_v23 }
  0x4c   :  { %434 = vmatprep.subr.mxu1 %v635_v0  ;;  %459 = vmatprep.subr.mxu0 %v635_v0 }
  0x4d   :  { %435 = vmatpush3.msra.mxu1 %v178_v13  ;;  %460 = vmatpush3.msra.mxu0 %v274_v24 }
  0x4e   :  { %436 = vmatprep.subr.mxu1 %v635_v0  ;;  %461 = vmatprep.subr.mxu0 %v635_v0 }
  0x4f   :  { %437 = vmatpush3.msra.mxu1 %v177_v14  ;;  %462 = vmatpush3.msra.mxu0 %v273_v25 }
  0x50   :  { %438 = vmatprep.subr.mxu1 %v635_v0  ;;  %463 = vmatprep.subr.mxu0 %v635_v0 }
  0x51   :  { %439 = vmatpush3.msra.mxu1 %v176_v15  ;;  %464 = vmatpush3.msra.mxu0 %v272_v26 }
  0x52   :  { %440 = vmatprep.subr.mxu1 %v635_v0  ;;  %465 = vmatprep.subr.mxu0 %v635_v0 }
  0x53   :  { %441 = vmatpush3.msra.mxu1 %v175_v16  ;;  %466 = vmatpush3.msra.mxu0 %v271_v27 }
  0x54   :  { %442 = vmatprep.subr.mxu1 %v635_v0  ;;  %467 = vmatprep.subr.mxu0 %v635_v0 }
  0x55   :  { %443 = vmatpush3.msra.mxu1 %v174_v17  ;;  %468 = vmatpush3.msra.mxu0 %v270_v28 }
  0x56   :  { %444 = vmatprep.subr.mxu1 %v635_v0  ;;  %469 = vmatprep.subr.mxu0 %v635_v0 }
  0x57   :  { %445 = vmatpush3.msra.mxu1 %v173_v18  ;;  %470 = vmatpush3.msra.mxu0 %v269_v29 }
  0x58   :  { %446 = vmatprep.subr.mxu1 %v635_v0  ;;  %471 = vmatprep.subr.mxu0 %v635_v0 }
  0x59   :  { %447 = vmatpush3.msra.mxu1 %v172_v19  ;;  %472 = vmatpush3.msra.mxu0 %v268_v30 }
  0x5a   :  { %448 = vmatprep.subr.mxu1 %v635_v0  ;;  %473 = vmatprep.subr.mxu0 %v635_v0 }
  0x5b   :  { %449 = vmatpush3.msra.mxu1 %v171_v20  ;;  %474 = vmatpush3.msra.mxu0 %v267_v31 }
  0x5c   :  { %450 = vmatprep.subr.mxu1 %v635_v0  ;;  %475 = vmatprep.subr.mxu0 %v635_v0 }
  0x5d   :  { %451 = vmatpush3.msra.mxu1 %v170_v21  ;;  %476 = vmatpush3.msra.mxu0 %v266_v32 }
  0x5e   :  { %477 = vmatprep.subr.mxu0 %v635_v0 }
  0x5f   :  { %478 = vmatpush3.msra.mxu0 %v265_v33 }
  0x60   :  { %479 = vmatprep.subr.mxu0 %v635_v0 }
  0x61   :  { %480 = vmatpush3.msra.mxu0 %v264_v34 }
  0x62   :  { %481 = vmatprep.subr.mxu0 %v635_v0 }
  0x63   :  { %482 = vmatpush3.msra.mxu0 %v263_v44 }
  0x64   :  { %483 = vmatprep.subr.mxu0 %v635_v0 }
  0x65   :  { %484 = vmatpush3.msra.mxu0 %v262_v45 }
  0x66   :  { %485 = vmatprep.subr.mxu0 %v635_v0 }
  0x67   :  { %486 = vmatpush3.msra.mxu0 %v261_v46 }
 0x106   :  { %v165_v40 = vpop.f32.mrf.mxu0 }
 0x107   :  { %v166_v41 = vadd.f32 %v165_v40, %v94_v39 }
 0x108   :  { %v419_v42 = vpop.f32.mrf.mxu0 }
 0x109   :  { %v169_v43 = vmax.f32 %v166_v41, 0.0 }
 0x10b   :  { %453 = vmatmul.mubr.f32.vlgmr.msra.gmra.mxu1 %v169_v43 }
 0x1cb   :  { %v256_v49 = vpop.f32.mrf.mxu1 }
 0x1cc   :  { %v257_v50 = vadd.f32 %v256_v49, %v189_v48 }
 0x1cd   :  { %v454_v51 = vpop.f32.mrf.mxu1 }
 0x1ce   :  { %v260_v52 = vmax.f32 %v257_v50, 0.0 }
 0x1d0   :  { %488 = vmatmul.mubr.f32.vlgmr.msra.gmra.mxu0 %v260_v52 }
 0x290   :  { %v347_v55 = vpop.f32.mrf.mxu0 }
 0x291   :  { %v348_v56 = vadd.f32 %v347_v55, %v280_v54 }
 0x292   :  { %v489_v57 = vpop.f32.mrf.mxu0 }
 0x293   :  { %351 = vst [vmem:[#allocation11] sm:$0xff] %v348_v56 }
 0x294   :  { %611 = shalt.err (!%p608_p1)
}
 0x295   :  { %361 = dma.vmem_to_hbm [thread:$0]  %s359_s4, 128, %s742_s5, [#allocation4]  }
 0x296   :  { %626 = dma.done.wait [#allocation4], 128  }
 0x297   :  { %627 = vsyncadd [#allocation4], 4294967168 }
 0x298   :  { %365 = vsyncpa [#allocation3], 1 }
 0x299   :  { %366 = vsyncpa [#allocation6], 1 }
 0x29a   :  { %367 = vsyncpa [#allocation9], 1 }
 0x29b   :  { %368 = vsyncpa [#allocation4], 1 }

</bundles_post_ra>
